<compile_context>
chip_gen: v7x
topology: tpu7x:2x2x1
jax: 0.10.0
libtpu: 0.0.40
codegen_flags: <defaults>
</compile_context>

<pallas_src>
import jax
import jax.numpy as jnp
from jax import lax
from jax.experimental import pallas as pl
from jax.experimental.pallas import tpu as pltpu

BN_EPS = 1e-5
_INV_SQRT2 = 0.7071067811865476


def _batchnorm_train(h, gamma, beta):
    """Training-mode BatchNorm1d (batch mean, biased variance), centered two-pass.

    Two-pass centered variance avoids the E[h^2] - mean^2 cancellation flagged in
    review; everything is f32 and the data is already resident in VMEM/vregs, so the
    extra pass is cheap VPU work.  Folded to a single multiply-add on the way out.
    """
    inv_n = jnp.float32(1.0 / h.shape[0])
    mean = jnp.sum(h, axis=0, keepdims=True) * inv_n
    d = h - mean
    var = jnp.sum(d * d, axis=0, keepdims=True) * inv_n
    return d * (gamma * lax.rsqrt(var + BN_EPS)) + beta


def _gelu_exact(h):
    # nn.GELU() default: exact erf formulation.
    # TODO(synk): tanh-approx GELU would move the transcendental to the otherwise-idle
    # EUP slot, but deviates from nn.GELU()'s exact numerics, so it is kept exact.
    return 0.5 * h * (1.0 + lax.erf(h * _INV_SQRT2))


# ----------------------------------------------------------------------------------
# Fused single-kernel path: grid = (out_dim // block_o,)
# ----------------------------------------------------------------------------------
def fused_kernel(x_ref, w1_ref, g1_ref, be1_ref, w2_ref, g2_ref, be2_ref,
                 o_ref, h_ref):
    @pl.when(pl.program_id(0) == 0)
    def _():
        # Stage 1 exactly once: Linear1 (bias cancels under BN1) -> BN1 -> GELU over the
        # whole hidden dim, cached in a bf16 VMEM scratch reused by every output tile.
        h = jnp.dot(x_ref[...].astype(jnp.bfloat16), w1_ref[...],
                    preferred_element_type=jnp.float32)
        h = _gelu_exact(_batchnorm_train(h, g1_ref[...], be1_ref[...]))
        h_ref[...] = h.astype(h_ref.dtype)

    # Stage 2 per output tile: Linear2 (bias cancels under BN2) -> BN2, stored once.
    y = jnp.dot(h_ref[...], w2_ref[...], preferred_element_type=jnp.float32)
    o_ref[...] = _batchnorm_train(y, g2_ref[...], be2_ref[...]).astype(o_ref.dtype)


# ----------------------------------------------------------------------------------
# Two-stage fallback path (large batches): h round-trips HBM once in bf16.
# ----------------------------------------------------------------------------------
def stage1_kernel(x_ref, w1_ref, g1_ref, be1_ref, h_ref):
    h = jnp.dot(x_ref[...].astype(jnp.bfloat16), w1_ref[...],
                preferred_element_type=jnp.float32)
    h = _gelu_exact(_batchnorm_train(h, g1_ref[...], be1_ref[...]))
    h_ref[...] = h.astype(h_ref.dtype)


def stage2_kernel(h_ref, w2_ref, g2_ref, be2_ref, o_ref):
    # The f32 output block is resident across the hidden-reduction axis k (its index map
    # ignores k), so Linear2 partials accumulate directly into it -- no acc scratch, no
    # final acc->o copy.  BN2 is applied in place on the last k step.
    k = pl.program_id(1)

    @pl.when(k == 0)
    def _():
        o_ref[...] = jnp.zeros_like(o_ref)

    o_ref[...] += jnp.dot(h_ref[...], w2_ref[...],
                          preferred_element_type=jnp.float32)

    @pl.when(k == pl.num_programs(1) - 1)
    def _():
        o_ref[...] = _batchnorm_train(o_ref[...], g2_ref[...], be2_ref[...])


# ----------------------------------------------------------------------------------
# Wrapper
# ----------------------------------------------------------------------------------
def projection_mlp(x, w1t, b1, g1, be1, w2t, b2, g2, be2,
                   *, block_o=256, block_h=256, stage2_block_h=None,
                   vmem_limit_bytes=None, force_two_stage=False):
    """Forward pass of projection_MLP.

    Weights pre-transposed: w1t (in_dim, hidden), w2t (hidden, out_dim).
    b1/b2 are accepted for interface parity with nn.Linear but dropped: under
    training-mode BatchNorm the mean subtraction cancels any per-feature constant.
    """
    del b1, b2  # exact no-ops under training-mode BN (NOT valid for eval-mode BN)

    n, in_dim = x.shape
    hidden = w1t.shape[1]
    out_dim = w2t.shape[1]

    block_o = min(block_o, out_dim)
    assert out_dim % block_o == 0 and (block_o % 128 == 0 or block_o == out_dim)
    # TODO(synk): pad feature dims that are not multiples of 128 (lane-dense tiles).

    if vmem_limit_bytes is None:
        # Headroom under v7x's 64 MiB/TC; v5e/v6e have 128 MiB and can go toward ~96 MiB.
        vmem_limit_bytes = 48 << 20

    # bf16 MXU operands; these are parameters, so callers should store them in bf16
    # (then astype is a no-op and no extra XLA cast pass is emitted).
    w1b = w1t.astype(jnp.bfloat16)
    w2b = w2t.astype(jnp.bfloat16)

    # Rough fused-path VMEM footprint: f32 x + full bf16 W1 + cached bf16 h (single
    # buffers, grid-invariant) plus double-buffered W2/out/gamma/beta tiles.
    fused_bytes = (n * in_dim * 4 + in_dim * hidden * 2 + n * hidden * 2
                   + 2 * (hidden * block_o * 2 + n * block_o * 4 + 4 * block_o * 4))
    use_fused = (not force_two_stage) and fused_bytes <= vmem_limit_bytes

    if use_fused:
        # TODO(synk): mark the grid-invariant x/W1/g1/be1 specs pipeline_mode=pl.Buffered(1)
        # once verified on the target jax version (drops their second pipeline buffer).
        return pl.pallas_call(
            fused_kernel,
            out_shape=jax.ShapeDtypeStruct((n, out_dim), jnp.float32),
            grid_spec=pltpu.PrefetchScalarGridSpec(
                num_scalar_prefetch=0,
                grid=(out_dim // block_o,),
                in_specs=[
                    pl.BlockSpec((n, in_dim), lambda j: (0, 0)),        # x (f32, cast in-kernel)
                    pl.BlockSpec((in_dim, hidden), lambda j: (0, 0)),   # full W1
                    pl.BlockSpec((1, hidden), lambda j: (0, 0)),        # gamma1
                    pl.BlockSpec((1, hidden), lambda j: (0, 0)),        # beta1
                    pl.BlockSpec((hidden, block_o), lambda j: (0, j)),  # W2 tile
                    pl.BlockSpec((1, block_o), lambda j: (0, j)),       # gamma2
                    pl.BlockSpec((1, block_o), lambda j: (0, j)),       # beta2
                ],
                out_specs=pl.BlockSpec((n, block_o), lambda j: (0, j)),
                scratch_shapes=[pltpu.VMEM((n, hidden), jnp.bfloat16)],  # cached h
            ),
            compiler_params=pltpu.CompilerParams(
                # "arbitrary": the cached-h scratch carries state from the j == 0 step,
                # so this axis must not be sharded across TensorCores.
                dimension_semantics=("arbitrary",),
                vmem_limit_bytes=vmem_limit_bytes,
            ),
        )(x, w1b, g1, be1, w2b, g2, be2)

    # ---------------- Two-stage fallback ----------------
    # TODO(synk): for batches too large even for per-stage full-batch blocks, add a
    # batch-tiled BN path (per-feature sum / sum-sq partials across a batch grid axis).
    block_h = min(block_h, hidden)
    assert hidden % block_h == 0 and (block_h % 128 == 0 or block_h == hidden)

    h = pl.pallas_call(
        stage1_kernel,
        out_shape=jax.ShapeDtypeStruct((n, hidden), jnp.bfloat16),
        grid_spec=pltpu.PrefetchScalarGridSpec(
            num_scalar_prefetch=0,
            grid=(hidden // block_h,),
            in_specs=[
                pl.BlockSpec((n, in_dim), lambda j: (0, 0)),        # full batch / in_dim
                pl.BlockSpec((in_dim, block_h), lambda j: (0, j)),  # W1 feature tile
                pl.BlockSpec((1, block_h), lambda j: (0, j)),       # gamma1
                pl.BlockSpec((1, block_h), lambda j: (0, j)),       # beta1
            ],
            out_specs=pl.BlockSpec((n, block_h), lambda j: (0, j)),
        ),
        compiler_params=pltpu.CompilerParams(
            dimension_semantics=("parallel",),
            vmem_limit_bytes=vmem_limit_bytes,
        ),
    )(x, w1b, g1, be1)

    if stage2_block_h is None:
        # Prefer a grid-invariant full-hidden h block (reduction axis vanishes and h is
        # fetched from HBM exactly once) when it fits the VMEM budget; otherwise tile.
        s2_bytes = 2 * (n * hidden * 2 + hidden * block_o * 2
                        + n * block_o * 4 + 4 * block_o * 4)
        stage2_block_h = hidden if s2_bytes <= vmem_limit_bytes else block_h
    stage2_block_h = min(stage2_block_h, hidden)
    assert hidden % stage2_block_h == 0 and (stage2_block_h % 128 == 0
                                             or stage2_block_h == hidden)

    out = pl.pallas_call(
        stage2_kernel,
        out_shape=jax.ShapeDtypeStruct((n, out_dim), jnp.float32),
        grid_spec=pltpu.PrefetchScalarGridSpec(
            num_scalar_prefetch=0,
            grid=(out_dim // block_o, hidden // stage2_block_h),
            in_specs=[
                pl.BlockSpec((n, stage2_block_h), lambda j, k: (0, k)),        # h tile
                pl.BlockSpec((stage2_block_h, block_o), lambda j, k: (k, j)),  # W2 tile
                pl.BlockSpec((1, block_o), lambda j, k: (0, j)),               # gamma2
                pl.BlockSpec((1, block_o), lambda j, k: (0, j)),               # beta2
            ],
            out_specs=pl.BlockSpec((n, block_o), lambda j, k: (0, j)),
        ),
        compiler_params=pltpu.CompilerParams(
            dimension_semantics=("parallel", "arbitrary"),
            vmem_limit_bytes=vmem_limit_bytes,
        ),
    )(h, w2b, g2, be2)
    return out


# ----------------------------------------------------------------------------------
# Pure-JAX reference (exact PyTorch forward semantics, biases included)
# ----------------------------------------------------------------------------------
def reference(x, w1t, b1, g1, be1, w2t, b2, g2, be2, matmul_dtype=jnp.float32):
    def bn(h, g, b):
        m = h.mean(0, keepdims=True)
        v = ((h - m) ** 2).mean(0, keepdims=True)
        return (h - m) / jnp.sqrt(v + BN_EPS) * g + b

    cast = lambda a: a.astype(matmul_dtype)
    h = jnp.dot(cast(x), cast(w1t), preferred_element_type=jnp.float32) + b1
    h = bn(h, g1, be1)
    h = 0.5 * h * (1.0 + lax.erf(h * _INV_SQRT2))
    y = jnp.dot(cast(h), cast(w2t), preferred_element_type=jnp.float32) + b2
    return bn(y, g2, be2)


if __name__ == "__main__":
    # Small shapes consistent with the module (hidden_dim = out_dim = 256 defaults,
    # bn2 requires OUT_DIM == HIDDEN), lane-dense feature dims, sublane-dense batch.
    N, IN_DIM, HIDDEN, OUT_DIM = 64, 128, 256, 256

    key = jax.random.PRNGKey(0)
    kx, kw1, kb1, kw2, kb2, kg1, kbe1, kg2, kbe2 = jax.random.split(key, 9)

    x = jax.random.normal(kx, (N, IN_DIM), jnp.float32)

    # nn.Linear-style uniform(-1/sqrt(fan_in), 1/sqrt(fan_in)) init.
    bound1 = 1.0 / (IN_DIM ** 0.5)
    w1t = jax.random.uniform(kw1, (IN_DIM, HIDDEN), jnp.float32, -bound1, bound1)
    b1 = jax.random.uniform(kb1, (1, HIDDEN), jnp.float32, -bound1, bound1)
    bound2 = 1.0 / (HIDDEN ** 0.5)
    w2t = jax.random.uniform(kw2, (HIDDEN, OUT_DIM), jnp.float32, -bound2, bound2)
    b2 = jax.random.uniform(kb2, (1, OUT_DIM), jnp.float32, -bound2, bound2)

    # Non-trivial BN affine params to exercise the fused scale/shift path.
    g1 = jax.random.uniform(kg1, (1, HIDDEN), jnp.float32, 0.5, 1.5)
    be1 = jax.random.uniform(kbe1, (1, HIDDEN), jnp.float32, -0.5, 0.5)
    g2 = jax.random.uniform(kg2, (1, OUT_DIM), jnp.float32, 0.5, 1.5)
    be2 = jax.random.uniform(kbe2, (1, OUT_DIM), jnp.float32, -0.5, 0.5)

    # Parameters stored in bf16 once, outside the per-call path (no per-call cast pass).
    w1t_bf16 = w1t.astype(jnp.bfloat16)
    w2t_bf16 = w2t.astype(jnp.bfloat16)

    # 1) Fused single-kernel path; block_o=128 so the grid has 2 output tiles and the
    #    cached-h pl.when(j == 0) pattern is exercised.
    out_fused = projection_mlp(x, w1t_bf16, b1, g1, be1, w2t_bf16, b2, g2, be2,
                               block_o=128)
    out_fused = jax.block_until_ready(out_fused)

    # 2) Two-stage fallback with a tiled hidden reduction (exercises the accumulate-
    #    into-o_ref path with init/finalize pl.when's).
    out_2stage = projection_mlp(x, w1t_bf16, b1, g1, be1, w2t_bf16, b2, g2, be2,
                                block_o=128, block_h=128, stage2_block_h=128,
                                force_two_stage=True)
    out_2stage = jax.block_until_ready(out_2stage)

    args = (x, w1t, b1, g1, be1, w2t, b2, g2, be2)
    ref_bf16 = reference(*args, matmul_dtype=jnp.bfloat16)  # same bf16 MXU operands
    ref_f32 = reference(*args, matmul_dtype=jnp.float32)    # exact module semantics

    for name, out in (("fused", out_fused), ("two_stage", out_2stage)):
        # Tight check vs a reference using the same bf16 matmul operands (validates the
        # grid/BN/GELU/accumulator logic); loose check vs exact f32 module semantics
        # (remaining gap is the accepted bf16 MXU quantization of x, W1, h, W2).
        assert jnp.allclose(out, ref_bf16, atol=2e-2, rtol=2e-2), \
            f"{name}: mismatch vs bf16-matched reference"
        assert jnp.allclose(out, ref_f32, atol=2e-1, rtol=2e-1), \
            f"{name}: mismatch vs f32 reference"

    print("KERNEL_OK")
</pallas_src>

<mosaic_0001>
module attributes {stable_mosaic.version = 11 : i64} {
  func.func @fused_kernel(%arg0: i32, %arg1: memref<64x128xf32, #tpu.memory_space<vmem>>, %arg2: memref<128x256xbf16, #tpu.memory_space<vmem>>, %arg3: memref<1x256xf32, #tpu.memory_space<vmem>>, %arg4: memref<1x256xf32, #tpu.memory_space<vmem>>, %arg5: memref<256x128xbf16, #tpu.memory_space<vmem>>, %arg6: memref<1x128xf32, #tpu.memory_space<vmem>>, %arg7: memref<1x128xf32, #tpu.memory_space<vmem>>, %arg8: memref<64x128xf32, #tpu.memory_space<vmem>>, %arg9: memref<64x256xbf16, #tpu.memory_space<vmem>>) attributes {dimension_semantics = [#tpu.dimension_semantics<arbitrary>], iteration_bounds = array<i64: 2>, scalar_prefetch = 0 : i64, scratch_operands = 1 : i64, tpu.core_type = #tpu.core_type<tc>, window_params = [{pipeline_mode = #tpu.pipeline_mode<synchronous>, transform_indices = @transform_0, window_bounds = array<i64: 64, 128>}, {pipeline_mode = #tpu.pipeline_mode<synchronous>, transform_indices = @transform_1, window_bounds = array<i64: 128, 256>}, {pipeline_mode = #tpu.pipeline_mode<synchronous>, transform_indices = @transform_2, window_bounds = array<i64: 1, 256>}, {pipeline_mode = #tpu.pipeline_mode<synchronous>, transform_indices = @transform_3, window_bounds = array<i64: 1, 256>}, {transform_indices = @transform_4, window_bounds = array<i64: 256, 128>}, {transform_indices = @transform_5, window_bounds = array<i64: 1, 128>}, {transform_indices = @transform_6, window_bounds = array<i64: 1, 128>}, {transform_indices = @transform_7, window_bounds = array<i64: 64, 128>}]} {
    %c0_i32 = arith.constant 0 : i32
    %0 = arith.cmpi eq, %arg0, %c0_i32 : i32
    %1 = arith.extui %0 : i1 to i32
    %c0_i32_0 = arith.constant 0 : i32
    %2 = arith.cmpi ne, %1, %c0_i32_0 : i32
    scf.if %2 {
      %c0_15 = arith.constant 0 : index
      %c0_16 = arith.constant 0 : index
      %28 = vector.load %arg1[%c0_15, %c0_16] : memref<64x128xf32, #tpu.memory_space<vmem>>, vector<64x128xf32>
      %29 = arith.truncf %28 : vector<64x128xf32> to vector<64x128xbf16>
      %c0_17 = arith.constant 0 : index
      %c0_18 = arith.constant 0 : index
      %30 = vector.load %arg2[%c0_17, %c0_18] : memref<128x256xbf16, #tpu.memory_space<vmem>>, vector<128x256xbf16>
      %cst_19 = arith.constant dense<0.000000e+00> : vector<64x256xf32>
      %31 = tpu.matmul %29, %30, %cst_19 {dimension_numbers = #tpu.dot_dimension_numbers<[1], [0], [0], [1], [0, 0, 1, 1], [], []>} : vector<64x128xbf16>, vector<128x256xbf16>, vector<64x256xf32> -> vector<64x256xf32>
      %c0_20 = arith.constant 0 : index
      %c0_21 = arith.constant 0 : index
      %32 = vector.load %arg3[%c0_20, %c0_21] : memref<1x256xf32, #tpu.memory_space<vmem>>, vector<1x256xf32>
      %c0_22 = arith.constant 0 : index
      %c0_23 = arith.constant 0 : index
      %33 = vector.load %arg4[%c0_22, %c0_23] : memref<1x256xf32, #tpu.memory_space<vmem>>, vector<1x256xf32>
      %cst_24 = arith.constant dense<0.000000e+00> : vector<256xf32>
      %34 = vector.multi_reduction <add>, %31, %cst_24 [0] : vector<64x256xf32> to vector<256xf32>
      %35 = vector.shape_cast %34 : vector<256xf32> to vector<1x256xf32>
      %cst_25 = arith.constant 1.562500e-02 : f32
      %36 = vector.broadcast %cst_25 : f32 to vector<1x256xf32>
      %37 = arith.mulf %35, %36 : vector<1x256xf32>
      %38 = vector.broadcast %37 : vector<1x256xf32> to vector<64x256xf32>
      %39 = arith.subf %31, %38 : vector<64x256xf32>
      %40 = arith.mulf %39, %39 : vector<64x256xf32>
      %cst_26 = arith.constant dense<0.000000e+00> : vector<256xf32>
      %41 = vector.multi_reduction <add>, %40, %cst_26 [0] : vector<64x256xf32> to vector<256xf32>
      %42 = vector.shape_cast %41 : vector<256xf32> to vector<1x256xf32>
      %cst_27 = arith.constant 1.562500e-02 : f32
      %43 = vector.broadcast %cst_27 : f32 to vector<1x256xf32>
      %44 = arith.mulf %42, %43 : vector<1x256xf32>
      %cst_28 = arith.constant 9.99999974E-6 : f32
      %45 = vector.broadcast %cst_28 : f32 to vector<1x256xf32>
      %46 = arith.addf %44, %45 : vector<1x256xf32>
      %47 = math.rsqrt %46 : vector<1x256xf32>
      %48 = arith.mulf %32, %47 : vector<1x256xf32>
      %49 = vector.broadcast %48 : vector<1x256xf32> to vector<64x256xf32>
      %50 = arith.mulf %39, %49 : vector<64x256xf32>
      %51 = vector.broadcast %33 : vector<1x256xf32> to vector<64x256xf32>
      %52 = arith.addf %50, %51 : vector<64x256xf32>
      %cst_29 = arith.constant 5.000000e-01 : f32
      %53 = vector.broadcast %cst_29 : f32 to vector<64x256xf32>
      %54 = arith.mulf %53, %52 : vector<64x256xf32>
      %cst_30 = arith.constant 0.707106769 : f32
      %55 = vector.broadcast %cst_30 : f32 to vector<64x256xf32>
      %56 = arith.mulf %52, %55 : vector<64x256xf32>
      %57 = math.erf %56 : vector<64x256xf32>
      %cst_31 = arith.constant 1.000000e+00 : f32
      %58 = vector.broadcast %cst_31 : f32 to vector<64x256xf32>
      %59 = arith.addf %58, %57 : vector<64x256xf32>
      %60 = arith.mulf %54, %59 : vector<64x256xf32>
      %61 = arith.truncf %60 : vector<64x256xf32> to vector<64x256xbf16>
      %c0_32 = arith.constant 0 : index
      %c0_33 = arith.constant 0 : index
      %62 = vector.load %arg9[%c0_32, %c0_33] : memref<64x256xbf16, #tpu.memory_space<vmem>>, vector<64x256xbf16>
      tpu.vector_store %arg9[%c0_32, %c0_33], %61 {strides = array<i32>} : memref<64x256xbf16, #tpu.memory_space<vmem>>, vector<64x256xbf16>,
    } else {
    }
    %c0 = arith.constant 0 : index
    %c0_1 = arith.constant 0 : index
    %3 = vector.load %arg9[%c0, %c0_1] : memref<64x256xbf16, #tpu.memory_space<vmem>>, vector<64x256xbf16>
    %c0_2 = arith.constant 0 : index
    %c0_3 = arith.constant 0 : index
    %4 = vector.load %arg5[%c0_2, %c0_3] : memref<256x128xbf16, #tpu.memory_space<vmem>>, vector<256x128xbf16>
    %cst = arith.constant dense<0.000000e+00> : vector<64x128xf32>
    %5 = tpu.matmul %3, %4, %cst {dimension_numbers = #tpu.dot_dimension_numbers<[1], [0], [0], [1], [0, 0, 1, 1], [], []>} : vector<64x256xbf16>, vector<256x128xbf16>, vector<64x128xf32> -> vector<64x128xf32>
    %c0_4 = arith.constant 0 : index
    %c0_5 = arith.constant 0 : index
    %6 = vector.load %arg6[%c0_4, %c0_5] : memref<1x128xf32, #tpu.memory_space<vmem>>, vector<1x128xf32>
    %c0_6 = arith.constant 0 : index
    %c0_7 = arith.constant 0 : index
    %7 = vector.load %arg7[%c0_6, %c0_7] : memref<1x128xf32, #tpu.memory_space<vmem>>, vector<1x128xf32>
    %cst_8 = arith.constant dense<0.000000e+00> : vector<128xf32>
    %8 = vector.multi_reduction <add>, %5, %cst_8 [0] : vector<64x128xf32> to vector<128xf32>
    %9 = vector.shape_cast %8 : vector<128xf32> to vector<1x128xf32>
    %cst_9 = arith.constant 1.562500e-02 : f32
    %10 = vector.broadcast %cst_9 : f32 to vector<1x128xf32>
    %11 = arith.mulf %9, %10 : vector<1x128xf32>
    %12 = vector.broadcast %11 : vector<1x128xf32> to vector<64x128xf32>
    %13 = arith.subf %5, %12 : vector<64x128xf32>
    %14 = arith.mulf %13, %13 : vector<64x128xf32>
    %cst_10 = arith.constant dense<0.000000e+00> : vector<128xf32>
    %15 = vector.multi_reduction <add>, %14, %cst_10 [0] : vector<64x128xf32> to vector<128xf32>
    %16 = vector.shape_cast %15 : vector<128xf32> to vector<1x128xf32>
    %cst_11 = arith.constant 1.562500e-02 : f32
    %17 = vector.broadcast %cst_11 : f32 to vector<1x128xf32>
    %18 = arith.mulf %16, %17 : vector<1x128xf32>
    %cst_12 = arith.constant 9.99999974E-6 : f32
    %19 = vector.broadcast %cst_12 : f32 to vector<1x128xf32>
    %20 = arith.addf %18, %19 : vector<1x128xf32>
    %21 = math.rsqrt %20 : vector<1x128xf32>
    %22 = arith.mulf %6, %21 : vector<1x128xf32>
    %23 = vector.broadcast %22 : vector<1x128xf32> to vector<64x128xf32>
    %24 = arith.mulf %13, %23 : vector<64x128xf32>
    %25 = vector.broadcast %7 : vector<1x128xf32> to vector<64x128xf32>
    %26 = arith.addf %24, %25 : vector<64x128xf32>
    %c0_13 = arith.constant 0 : index
    %c0_14 = arith.constant 0 : index
    %27 = vector.load %arg8[%c0_13, %c0_14] : memref<64x128xf32, #tpu.memory_space<vmem>>, vector<64x128xf32>
    tpu.vector_store %arg8[%c0_13, %c0_14], %26 {strides = array<i32>} : memref<64x128xf32, #tpu.memory_space<vmem>>, vector<64x128xf32>,
    return
  }
  func.func @transform_0(%arg0: i32) -> (i32, i32) {
    %c0_i32 = arith.constant 0 : i32
    %c0_i32_0 = arith.constant 0 : i32
    %c0_i32_1 = arith.constant 0 : i32
    return %c0_i32, %c0_i32_0 : i32, i32
  }
  func.func @transform_1(%arg0: i32) -> (i32, i32) {
    %c0_i32 = arith.constant 0 : i32
    %c0_i32_0 = arith.constant 0 : i32
    %c0_i32_1 = arith.constant 0 : i32
    return %c0_i32, %c0_i32_0 : i32, i32
  }
  func.func @transform_2(%arg0: i32) -> (i32, i32) {
    %c0_i32 = arith.constant 0 : i32
    %c0_i32_0 = arith.constant 0 : i32
    %c0_i32_1 = arith.constant 0 : i32
    return %c0_i32, %c0_i32_0 : i32, i32
  }
  func.func @transform_3(%arg0: i32) -> (i32, i32) {
    %c0_i32 = arith.constant 0 : i32
    %c0_i32_0 = arith.constant 0 : i32
    %c0_i32_1 = arith.constant 0 : i32
    return %c0_i32, %c0_i32_0 : i32, i32
  }
  func.func @transform_4(%arg0: i32) -> (i32, i32) {
    %c0_i32 = arith.constant 0 : i32
    %c0_i32_0 = arith.constant 0 : i32
    return %c0_i32, %arg0 : i32, i32
  }
  func.func @transform_5(%arg0: i32) -> (i32, i32) {
    %c0_i32 = arith.constant 0 : i32
    %c0_i32_0 = arith.constant 0 : i32
    return %c0_i32, %arg0 : i32, i32
  }
  func.func @transform_6(%arg0: i32) -> (i32, i32) {
    %c0_i32 = arith.constant 0 : i32
    %c0_i32_0 = arith.constant 0 : i32
    return %c0_i32, %arg0 : i32, i32
  }
  func.func @transform_7(%arg0: i32) -> (i32, i32) {
    %c0_i32 = arith.constant 0 : i32
    %c0_i32_0 = arith.constant 0 : i32
    return %c0_i32, %arg0 : i32, i32
  }
}

</mosaic_0001>

<bundles_post_ra>
// kernel: tpu_custom_call.1
= control target key start
LH: loop header
LB: loop body
LE: loop exit
PB: predicated region body
PF: predicated region fallthrough
CT: control target
= control target key end

     0   :  { %12 = vsyncpa [#allocation4], 0  ;;  %s2117_s0 = inlined_call_operand.hbm [shape: f32[64,128], index: 0, kind: input, shape index: {}]   ;;  %s2118_s1 = inlined_call_operand.hbm [shape: bf16[128,256], index: 1, kind: input, shape index: {}]   ;;  %s2119_s2 = inlined_call_operand.vmem [shape: f32[1,256], index: 2, kind: input, shape index: {}]   ;;  %s2120_s3 = inlined_call_operand.vmem [shape: f32[1,256], index: 3, kind: input, shape index: {}]   ;;  %s2121_s4 = inlined_call_operand.hbm [shape: bf16[256,256], index: 4, kind: input, shape index: {}]   ;;  %s2122_s5 = inlined_call_operand.vmem [shape: f32[1,256], index: 5, kind: input, shape index: {}]   ;;  %s2123_s6 = inlined_call_operand.vmem [shape: f32[1,256], index: 6, kind: input, shape index: {}]   ;;  %s2124_s7 = inlined_call_operand.hbm [shape: f32[64,256], index: 7, kind: output, shape index: {}]  }
   0x1   :  { %13 = vsyncpa [#allocation7], 0 }
   0x2   :  { %14 = vsyncpa [#allocation5], 0 }
   0x3   :  { %16 = vsyncpa [#allocation5 + $0x1], 0  ;;  %s1700_s24 = smov 0   ;;  %s1702_s25 = smov 0  }
   0x4   :  { %s1704_s26 = smov 0   ;;  %s1706_s27 = smov 0  }
   0x5 LB: > { %s1721_s28 = sadd.s32 4294967295, %s1645_s27   ;;  %s1209_s29 = sadd.s32 4294967294, %s1645_s27   ;;  %s1645_s27 = sphi %s1706_s27, %s2154_s27   ;;  %s1641_s26 = sphi %s1704_s26, %s2158_s26   ;;  %s1637_s25 = sphi %s1702_s25, %s2157_s25   ;;  %s1633_s24 = sphi %s1700_s24, %s2156_s24  }
   0x6   : > { %s1725_s30 = sadd.s32 1, %s1645_s27   ;;  %s113_s8 = sadd.s32 1, %s1641_s26 }
   0x7   : > { %2132 = sst [smem:[#allocation14_spill]] %s1725_s30  ;;  %s110_s9 = ssub.s32 %s1645_s27, %s1725_s30 }
   0x8   : > { %p120_p0 = scmp.ne.s32.totalorder %s1641_s26, %s1637_s25  ;;  %p111_p1 = scmp.eq.s32.totalorder %s110_s9, 0 }
   0x9   : > { %p121_p2 = scmp.eq.s32.totalorder %s1645_s27, 0  ;;  %p126_p3 = scmp.ne.s32.totalorder %s1637_s25, %s1633_s24 }
   0xa   : > { %p2125_p4 = scmp.eq.s32.totalorder %s1721_s28, 0  ;;  %p202_p7 = scmp.eq.s32.totalorder %s1721_s28, 1 }
   0xb   : > { %s1737_s10 = scalar_select %p111_p1, %s1641_s26, %s113_s8  }
   0xc   : > { %p1739_p5 = por %p121_p2, %p120_p0  ;;  %p1745_p6 = por %p2125_p4, %p126_p3 }
   0xd   : > { %2133 = sst [smem:[#allocation15_spill]] %s1737_s10  ;;  %p208_p8 = scmp.eq.s32.totalorder %s1209_s29, 1 }
   0xe   : > { %s2134_s11 = scalar_select %p1739_p5, 1, 0 }
   0xf   : > { %s2135_s12 = scalar_select %p1745_p6, 1, 0 }
  0x10   : > { %p1210_p9 = scmp.ge.s32.totalorder %s1645_s27, 1  ;;  %p215_p10 = scmp.lt.s32.totalorder %s1645_s27, 3 }
  0x11   : > { %p1752_p11 = por %p202_p7, %p120_p0  ;;  %p1756_p12 = por %p208_p8, %p126_p3 }
  0x12   : > { %p1760_p13 = pnand %p1210_p9, %p215_p10  ;;  %s1647_s16 = smov [#allocation3]  }
  0x13   : > { %s2136_s13 = scalar_select %p1752_p11, 1, 0 }
  0x14   : > { %s2137_s14 = scalar_select %p1756_p12, 1, 0 }
  0x15   : > { %s2138_s15 = scalar_select %p1760_p13, 1, 0 }
  0x16   : > { %p1343_p2 = pneg %p1760_p13  ;;  %s227_s17 = sshll.u32 %s1647_s16, 4  ;;  %s228_s17 = int_to_ptr.vmem [resolvable:$true] %s227_s17 }
  0x17   : > { %s1648_s19 = smov [#allocation6]   ;;  %s1485_s23 = scalar_lea.hbm %s2117_s0, 1024 }
  0x18   : > { %p1769_p0 = pnand %p1343_p2, %p2125_p4  ;;  %s240_s20 = sshll.u32 %s1648_s19, 4  ;;  %s241_s20 = int_to_ptr.vmem [resolvable:$true] %s240_s20 }
  0x19   : > { %p1486_p8 = scmp.ne.s32.totalorder %s2117_s0, %s1485_s23  ;;  %p1492_p3 = scmp.lt.u32.totalorder %s1485_s23, %s2117_s0 }
  0x1a   : > { %p1487_p9 = pneg %p1769_p0 }
  0x1c   : > { %p1488_p10 = pnand %p1487_p9, %p1486_p8 }
  0x1e   : > { %p1489_p2 = pneg %p1488_p10 }
  0x20   : > { %p1494_p1 = pnand %p1492_p3, %p1489_p2 }
  0x22   : > { %1497 = shalt.err (!%p1494_p1)
}
  0x23   : > { %s1498_s19 = scalar_lea.vmem %s228_s17, 1024  ;;  %p1506_p11 = scmp.lt.s32.totalorder %s228_s17, %s228_s17 }
  0x24   : > { %p1499_p4 = scmp.ne.s32.totalorder %s228_s17, %s1498_s19  ;;  %p1507_p6 = scmp.lt.s32.totalorder %s1498_s19, %s1498_s19 }
  0x26   : > { %p1501_p7 = pnand %p1499_p4, %p1487_p9  ;;  %p1508_p13 = por %p1507_p6, %p1506_p11 }
  0x28   : > { %p1502_p12 = pneg %p1501_p7 }
  0x2a   : > { %p1509_p5 = pnand %p1508_p13, %p1502_p12 }
  0x2c   : > { %1512 = shalt.err (!%p1509_p5)
}
  0x2d   : > { %s1649_s21 = smov 128   ;;  %s1650_s22 = smov 8  }
  0x2e   : > { %1346 = dma.hbm_to_vmem [thread:$0]  (!%p1769_p0), %s2117_s0, 1024, %s228_s17, [#allocation4], %s1649_s21, %s1649_s21, %s1650_s22  }
  0x2f   : > { %p2140_p4 = scmp.ne.s32.totalorder %s2134_s11, 0  ;;  %p2141_p1 = scmp.lt.s32.totalorder %s1645_s27, 2 }
  0x30   : > { %s1513_s19 = scalar_lea.hbm %s2118_s1, 2048 }
  0x31   : > { %p1803_p3 = pnand %p2141_p1, %p2140_p4  ;;  %p1514_p5 = scmp.ne.s32.totalorder %s2118_s1, %s1513_s19 }
  0x32   : > { %p1520_p12 = scmp.lt.u32.totalorder %s1513_s19, %s2118_s1 }
  0x33   : > { %s2142_s8 = scalar_select %p1803_p3, 1, 0 }
  0x34   : > { %p1516_p6 = pnand %p1514_p5, %p1487_p9 }
  0x36   : > { %p1517_p11 = pneg %p1516_p6 }
  0x38   : > { %p1522_p13 = pnand %p1520_p12, %p1517_p11 }
  0x3a   : > { %1525 = shalt.err (!%p1522_p13)
}
  0x3b   : > { %s1526_s23 = scalar_lea.vmem %s241_s20, 2048  ;;  %p1534_p2 = scmp.lt.s32.totalorder %s241_s20, %s241_s20 }
  0x3c   : > { %p1527_p7 = scmp.ne.s32.totalorder %s241_s20, %s1526_s23  ;;  %p1535_p4 = scmp.lt.s32.totalorder %s1526_s23, %s1526_s23 }
  0x3e   : > { %p1529_p8 = pnand %p1527_p7, %p1487_p9  ;;  %p1536_p1 = por %p1535_p4, %p1534_p2 }
  0x40   : > { %p1530_p10 = pneg %p1529_p8 }
  0x42   : > { %p1537_p3 = pnand %p1536_p1, %p1530_p10 }
  0x44   : > { %1540 = shalt.err (!%p1537_p3)
}
  0x45   : > { %1349 = dma.hbm_to_vmem [thread:$0]  (!%p1769_p0), %s2118_s1, 2048, %s241_s20, [#allocation7], %s1649_s21, %s1649_s21, %s1650_s22  }
  0x46   : > { %s260_s29 = sand.u32 1, %s1645_s27   ;;  %s262_s9 = sand.u32 1, %s1641_s26  }
  0x47   : > { %s1214_s16 = sshll.u32 %s262_s9, 7  ;;  %s1215_s19 = sshll.u32 %s1645_s27, 6 }
  0x48   : > { %s1835_s23 = scalar_lea.hbm %s2121_s4, %s1215_s19  ;;  %s264_s18 = scalar_lea.vmem [#allocation8], %s1214_s16 }
  0x49   : > { %s270_s30 = sshll.u32 %s264_s18, 4  ;;  %s1839_s10 = scalar_lea.sflag [#allocation4], %s260_s29  ;;  %s1837_s30 = int_to_ptr.vmem [resolvable:$true] %s270_s30 }
  0x4a   : > { %s1541_s20 = scalar_lea.hbm %s1835_s23, 2048  ;;  %p2143_p9 = scmp.ne.s32.totalorder %s2142_s8, 0 }
  0x4b   : > { %p1542_p0 = scmp.ne.s32.totalorder %s1835_s23, %s1541_s20  ;;  %s1546_s19 = scalar_lea.hbm %s2121_s4, 4096 }
  0x4c   : > { %p1543_p3 = pneg %p2143_p9  ;;  %p1547_p11 = scmp.lt.u32.totalorder %s1835_s23, %s2121_s4 }
  0x4d   : > { %p1548_p12 = scmp.lt.u32.totalorder %s1546_s19, %s1541_s20  ;;  %p1550_p7 = scmp.lt.u32.totalorder %s1541_s20, %s1835_s23 }
  0x4e   : > { %p1544_p5 = pnand %p1543_p3, %p1542_p0 }
  0x4f   : > { %p1549_p13 = por %p1548_p12, %p1547_p11 }
  0x50   : > { %p1545_p6 = pneg %p1544_p5 }
  0x51   : > { %p1551_p8 = por %p1550_p7, %p1549_p13 }
  0x53   : > { %p1552_p10 = pnand %p1551_p8, %p1545_p6 }
  0x55   : > { %1555 = shalt.err (!%p1552_p10)
}
  0x56   : > { %s1556_s29 = scalar_lea.vmem %s1837_s30, 2048  ;;  %s1651_s16 = smov [#allocation8]  }
  0x57   : > { %p1557_p2 = scmp.ne.s32.totalorder %s1837_s30, %s1556_s29  ;;  %s1561_s18 = sshll.u32 %s1651_s16, 4  ;;  %s1562_s18 = int_to_ptr.vmem [resolvable:$false] %s1561_s18 }
  0x58   : > { %s1563_s22 = scalar_lea.vmem %s1562_s18, 4096  ;;  %p1564_p0 = scmp.lt.s32.totalorder %s1837_s30, %s1562_s18 }
  0x59   : > { %p1559_p4 = pnand %p1557_p2, %p1543_p3  ;;  %p1565_p5 = scmp.lt.s32.totalorder %s1563_s22, %s1556_s29 }
  0x5b   : > { %p1560_p1 = pneg %p1559_p4  ;;  %p1566_p11 = por %p1565_p5, %p1564_p0 }
  0x5d   : > { %p1567_p12 = pnand %p1566_p11, %p1560_p1 }
  0x5f   : > { %1570 = shalt.err (!%p1567_p12)
}
  0x60   : > { %s1652_s20 = smov 64   ;;  %s1653_s9 = smov 4  }
  0x61   : > { %1353 = dma.hbm_to_vmem [thread:$0]  (!%p2143_p9), %s1835_s23, 2048, %s1837_s30, %s1839_s10, %s1649_s21, %s1652_s20, %s1653_s9  }
  0x62   : > { %p2144_p3 = scmp.ne.s32.totalorder %s2138_s15, 0 }
  0x63   : > { %p2145_p6 = scmp.eq.s32.totalorder (!%p2144_p3), %s1721_s28, 0 }
  0x64   : > { %294 = sbr.rel (%p2144_p3) target bundleno = 853 (0x355), region = 48 }
  0x6b   : > { %1616 = dma.done.wait (%p2145_p6), [#allocation4], 1024   ;;  %p2146_p13 = pmov %p2145_p6 }
  0x6c   : > { %p2147_p7 = pmov %p2145_p6 }
  0x6d   : > { %1618 = vsyncadd (%p2146_p13), [#allocation4], 4294966272 }
  0x6e   : > { %1620 = dma.done.wait (%p2147_p7), [#allocation7], 2048   ;;  %p2148_p8 = pmov %p2145_p6 }
  0x6f   : > { %s304_s8 = sand.u32 1, %s1721_s28   ;;  %s1880_s21 = sand.u32 1, %s1637_s25  }
  0x70   : > { %1622 = vsyncadd (%p2148_p8), [#allocation7], 4294965248  ;;  %s1219_s15 = sshll.u32 %s1880_s21, 7  ;;  %s305_s23 = scalar_lea.sflag [#allocation4], %s304_s8 }
  0x71   : > { %s1883_s30 = scalar_lea.vmem [#allocation8], %s1219_s15  ;;  %p2149_p9 = scmp.ne.s32.totalorder %s2135_s12, 0 }
  0x73   : > { %1624 = dma.done.wait (%p2149_p9), %s305_s23, 2048  }
  0x74   : > { %1626 = vsyncadd (%p2149_p9), %s305_s23, 4294965248  ;;  %s1220_s10 = sshll.u32 %s1880_s21, 6  ;;  %p345_p10 = scmp.lt.s32.totalorder %s1721_s28, 1 }
  0x75   : > { %s1902_s20 = scalar_lea.vmem [#allocation9], %s1220_s10  ;;  %p2150_p2 = scmp.ne.s32.totalorder %s1721_s28, 0 }
  0x76   : > { %s1892_s19 = scalar_select %p345_p10, %s1721_s28, 1 }
  0x77   : > { %355 = sbr.rel (%p2150_p2) target bundleno = 499 (0x1f3), region = 64  ;;  %v1407_v0 = vld [vmem:[#allocation6 + $0x4] ss:$8 sps:$4 sm:$0xff] (!%p2150_p2)   ;;  %v1409_v1 = vld [vmem:[#allocation6] ss:$8 sps:$4 sm:$0xff] (!%p2150_p2)   ;;  %v1654_v2 = vmov (!%p2150_p2), 0  }
  0x78   : > { %s347_s29 = scalar_lea.vmem %s2122_s5, %s1892_s19  ;;  %s350_s22 = scalar_lea.vmem %s2123_s6, %s1892_s19  ;;  %496 = vmatprep.mubr.bf16.mxu0 (!%p2150_p2), %v1654_v2  ;;  %516 = vmatprep.mubr.bf16.mxu1 (!%p2150_p2), %v1654_v2  ;;  %v1410_v3 = vld [vmem:[#allocation6 + $0x14] ss:$8 sps:$4 sm:$0xff] (!%p2150_p2)   ;;  %v1412_v4 = vld [vmem:[#allocation6 + $0x10] ss:$8 sps:$4 sm:$0xff] (!%p2150_p2)   ;;  %v1413_v5 = vld [vmem:[#allocation6 + $0x24] ss:$8 sps:$4 sm:$0xff] (!%p2150_p2)  }
  0x79   : > { %464 = vmatprep.subr.bf16.mxu0 (!%p2150_p2), %v1407_v0  ;;  %1299 = vmatprep.subr.bf16.mxu1 (!%p2150_p2), %v1407_v0  ;;  %v1415_v6 = vld [vmem:[#allocation6 + $0x20] ss:$8 sps:$4 sm:$0xff] (!%p2150_p2)   ;;  %v1416_v7 = vld [vmem:[#allocation6 + $0x34] ss:$8 sps:$4 sm:$0xff] (!%p2150_p2)   ;;  %v1418_v8 = vld [vmem:[#allocation6 + $0x30] ss:$8 sps:$4 sm:$0xff] (!%p2150_p2)  }
  0x7a   : > { %465 = vmatpush1.bf16.msra.mxu0 (!%p2150_p2), %v1409_v1  ;;  %1307 = vmatpush1.bf16.msra.mxu1 (!%p2150_p2), %v1409_v1  ;;  %v1419_v9 = vld [vmem:[#allocation6 + $0x44] ss:$8 sps:$4 sm:$0xff] (!%p2150_p2)   ;;  %v1421_v10 = vld [vmem:[#allocation6 + $0x40] ss:$8 sps:$4 sm:$0xff] (!%p2150_p2)   ;;  %v1422_v11 = vld [vmem:[#allocation6 + $0x54] ss:$8 sps:$4 sm:$0xff] (!%p2150_p2)  }
  0x7b   : > { %466 = vmatprep.subr.bf16.mxu0 (!%p2150_p2), %v1410_v3  ;;  %1300 = vmatprep.subr.bf16.mxu1 (!%p2150_p2), %v1410_v3  ;;  %v1424_v12 = vld [vmem:[#allocation6 + $0x50] ss:$8 sps:$4 sm:$0xff] (!%p2150_p2)   ;;  %v1425_v13 = vld [vmem:[#allocation6 + $0x64] ss:$8 sps:$4 sm:$0xff] (!%p2150_p2)   ;;  %v1427_v14 = vld [vmem:[#allocation6 + $0x60] ss:$8 sps:$4 sm:$0xff] (!%p2150_p2)  }
  0x7c   : > { %v1428_v15 = vld [vmem:[#allocation6 + $0x74] ss:$8 sps:$4 sm:$0xff] (!%p2150_p2)   ;;  %v1430_v16 = vld [vmem:[#allocation6 + $0x70] ss:$8 sps:$4 sm:$0xff] (!%p2150_p2)   ;;  %v356_v17 = vld [vmem:[#allocation3] sm:$0xff] (!%p2150_p2) }
  0x7d   : > { %v357_v18 = vld [vmem:[#allocation3 + $0x8] sm:$0xff] (!%p2150_p2)  ;;  %v360_v19 = vld [vmem:[#allocation3 + $0x20] sm:$0xff] (!%p2150_p2)  ;;  %v358_v23 = vld [vmem:[#allocation3 + $0x10] sm:$0xff] (!%p2150_p2) }
  0x7e   : > { %467 = vmatpush1.bf16.msra.mxu0 %v1412_v4  ;;  %1308 = vmatpush1.bf16.msra.mxu1 %v1412_v4  ;;  %v361_v20 = vld [vmem:[#allocation3 + $0x28] sm:$0xff]  ;;  %v364_v21 = vpack.c.bf16 %v357_v18, %v356_v17  ;;  %v359_v24 = vld [vmem:[#allocation3 + $0x18] sm:$0xff]  ;;  %v362_v25 = vld [vmem:[#allocation3 + $0x30] sm:$0xff] }
  0x7f   : > { %468 = vmatprep.subr.bf16.mxu0 %v1413_v5  ;;  %1301 = vmatprep.subr.bf16.mxu1 %v1413_v5  ;;  %v366_v22 = vpack.c.bf16 %v361_v20, %v360_v19  ;;  %v363_v26 = vld [vmem:[#allocation3 + $0x38] sm:$0xff]  ;;  %v365_v27 = vpack.c.bf16 %v359_v24, %v358_v23 }
  0x80   : > { %v367_v28 = vpack.c.bf16 %v363_v26, %v362_v25 }
  0x82   : > { %469 = vmatpush1.bf16.msra.mxu0 %v1415_v6  ;;  %1309 = vmatpush1.bf16.msra.mxu1 %v1415_v6 }
  0x83   : > { %470 = vmatprep.subr.bf16.mxu0 %v1416_v7  ;;  %1302 = vmatprep.subr.bf16.mxu1 %v1416_v7 }
  0x86   : > { %471 = vmatpush1.bf16.msra.mxu0 %v1418_v8  ;;  %1310 = vmatpush1.bf16.msra.mxu1 %v1418_v8 }
  0x87   : > { %472 = vmatprep.subr.bf16.mxu0 %v1419_v9  ;;  %1303 = vmatprep.subr.bf16.mxu1 %v1419_v9 }
  0x8a   : > { %473 = vmatpush1.bf16.msra.mxu0 %v1421_v10  ;;  %1311 = vmatpush1.bf16.msra.mxu1 %v1421_v10 }
  0x8b   : > { %474 = vmatprep.subr.bf16.mxu0 %v1422_v11  ;;  %1304 = vmatprep.subr.bf16.mxu1 %v1422_v11 }
  0x8e   : > { %475 = vmatpush1.bf16.msra.mxu0 %v1424_v12  ;;  %1312 = vmatpush1.bf16.msra.mxu1 %v1424_v12 }
  0x8f   : > { %476 = vmatprep.subr.bf16.mxu0 %v1425_v13  ;;  %1305 = vmatprep.subr.bf16.mxu1 %v1425_v13 }
  0x92   : > { %477 = vmatpush1.bf16.msra.mxu0 %v1427_v14  ;;  %1313 = vmatpush1.bf16.msra.mxu1 %v1427_v14 }
  0x93   : > { %478 = vmatprep.subr.bf16.mxu0 %v1428_v15  ;;  %1306 = vmatprep.subr.bf16.mxu1 %v1428_v15 }
  0x96   : > { %479 = vmatpush1.bf16.msra.mxu0 %v1430_v16  ;;  %1314 = vmatpush1.bf16.msra.mxu1 %v1430_v16 }
  0x99   : > { %497 = vmatmul.mubr.bf16.vlgmr.msra.gmra.mrb[0].mxu0 %v364_v21  ;;  %517 = vmatmul.mubr.bf16.vlgmr.msra.gmra.mrb[0].mxu1 %v366_v22 }
  0x9a   : > { %506 = vmatprep.mubr.bf16.mxu0 %v1654_v2  ;;  %526 = vmatprep.mubr.bf16.mxu1 %v1654_v2 }
  0xa1   : > { %507 = vmatmul.mubr.bf16.gmra.mrb[4].mxu0 %v365_v27  ;;  %527 = vmatmul.mubr.bf16.gmra.mrb[4].mxu1 %v367_v28 }
 0x16c   : > { %v498_v29 = vpop.f32.mrb[0].mxu0  ;;  %v518_v30 = vpop.f32.mrb[0].mxu1 }
 0x16d   : > { %v500_v31 = vpop.f32.mrb[1].mxu0  ;;  %v520_v32 = vpop.f32.mrb[1].mxu1 }
 0x16e   : > { %v502_v33 = vpop.f32.mrb[2].mxu0  ;;  %v522_v34 = vpop.f32.mrb[2].mxu1 }
 0x16f   : > { %v539_v35 = vadd.f32 %v502_v33, %v498_v29  ;;  %v504_v36 = vpop.f32.mrb[3].mxu0  ;;  %v524_v37 = vpop.f32.mrb[3].mxu1 }
 0x170   : > { %v552_v38 = vadd.f32 %v504_v36, %v500_v31 }
 0x174   : > { %v508_v39 = vpop.f32.mrb[4].mxu0  ;;  %v528_v40 = vpop.f32.mrb[4].mxu1 }
 0x175   : > { %v540_v41 = vadd.f32 %v539_v35, %v508_v39  ;;  %v510_v42 = vpop.f32.mrb[5].mxu0  ;;  %v530_v43 = vpop.f32.mrb[5].mxu1 }
 0x176   : > { %v553_v44 = vadd.f32 %v552_v38, %v510_v42  ;;  %v512_v45 = vpop.f32.mrb[6].mxu0  ;;  %v532_v46 = vpop.f32.mrb[6].mxu1 }
 0x177   : > { %v541_v47 = vadd.f32 %v540_v41, %v512_v45  ;;  %v514_v48 = vpop.f32.mrb[7].mxu0  ;;  %v534_v49 = vpop.f32.mrb[7].mxu1 }
 0x178   : > { %v554_v50 = vadd.f32 %v553_v44, %v514_v48 }
 0x179   : > { %v542_v51 = vadd.f32 %v541_v47, %v518_v30 }
 0x17a   : > { %v555_v52 = vadd.f32 %v554_v50, %v520_v32 }
 0x17b   : > { %v543_v53 = vadd.f32 %v542_v51, %v522_v34 }
 0x17c   : > { %v556_v54 = vadd.f32 %v555_v52, %v524_v37 }
 0x17d   : > { %v544_v55 = vadd.f32 %v543_v53, %v528_v40 }
 0x17e   : > { %v557_v56 = vadd.f32 %v556_v54, %v530_v43 }
 0x17f   : > { %v545_v57 = vadd.f32 %v544_v55, %v532_v46 }
 0x180   : > { %v558_v58 = vadd.f32 %v557_v56, %v534_v49 }
 0x181   : > { %v546_v59 = vrot.slane %v545_v57, 4 }
 0x182   : > { %v559_v60 = vrot.slane %v558_v58, 4 }
 0x183   : > { %v547_v61 = vadd.f32 %v546_v59, %v545_v57 }
 0x184   : > { %v560_v62 = vadd.f32 %v559_v60, %v558_v58 }
 0x185   : > { %v548_v63 = vrot.slane %v547_v61, 2 }
 0x186   : > { %v561_v0 = vrot.slane %v560_v62, 2 }
 0x187   : > { %v549_v1 = vadd.f32 %v548_v63, %v547_v61 }
 0x188   : > { %v562_v2 = vadd.f32 %v561_v0, %v560_v62 }
 0x189   : > { %v550_v3 = vrot.slane %v549_v1, 1 }
 0x18a   : > { %v563_v4 = vrot.slane %v562_v2, 1 }
 0x18b   : > { %v551_v5 = vadd.f32 %v550_v3, %v549_v1 }
 0x18c   : > { %v564_v6 = vadd.f32 %v563_v4, %v562_v2 }
 0x18d   : > { %v565_v7 = vmul.f32 0.015625, %v551_v5 }
 0x18e   : > { %v566_v8 = vmul.f32 0.015625, %v564_v6 }
 0x18f   : > { %v1906_v9 = vsub.f32 %v498_v29, %v565_v7  ;;  %v1908_v10 = vsub.f32 %v502_v33, %v565_v7  ;;  %v1910_v11 = vsub.f32 %v508_v39, %v565_v7  ;;  %v1912_v12 = vsub.f32 %v512_v45, %v565_v7 }
 0x190   : > { %v1914_v13 = vsub.f32 %v518_v30, %v565_v7  ;;  %v1916_v14 = vsub.f32 %v522_v34, %v565_v7  ;;  %v1918_v15 = vsub.f32 %v528_v40, %v565_v7  ;;  %v1920_v16 = vsub.f32 %v532_v46, %v565_v7 }
 0x191   : > { %v583_v17 = vmul.f32 %v1906_v9, %v1906_v9  ;;  %v585_v18 = vmul.f32 %v1908_v10, %v1908_v10  ;;  %v587_v19 = vmul.f32 %v1910_v11, %v1910_v11  ;;  %v589_v20 = vmul.f32 %v1912_v12, %v1912_v12 }
 0x192   : > { %v1930_v22 = vsub.f32 %v500_v31, %v566_v8  ;;  %v1932_v23 = vsub.f32 %v504_v36, %v566_v8  ;;  %v1934_v24 = vsub.f32 %v510_v42, %v566_v8  ;;  %v1936_v25 = vsub.f32 %v514_v48, %v566_v8 }
 0x193   : > { %v599_v21 = vadd.f32 %v585_v18, %v583_v17  ;;  %v1938_v26 = vsub.f32 %v520_v32, %v566_v8  ;;  %v1940_v27 = vsub.f32 %v524_v37, %v566_v8  ;;  %v1942_v28 = vsub.f32 %v530_v43, %v566_v8 }
 0x194   : > { %v1944_v30 = vsub.f32 %v534_v49, %v566_v8  ;;  %v584_v33 = vmul.f32 %v1930_v22, %v1930_v22  ;;  %v586_v31 = vmul.f32 %v1932_v23, %v1932_v23  ;;  %v591_v34 = vmul.f32 %v1914_v13, %v1914_v13 }
 0x195   : > { %v600_v29 = vadd.f32 %v599_v21, %v587_v19  ;;  %v588_v32 = vmul.f32 %v1934_v24, %v1934_v24  ;;  %v593_v37 = vmul.f32 %v1916_v14, %v1916_v14  ;;  %v590_v39 = vmul.f32 %v1936_v25, %v1936_v25 }
 0x196   : > { %v612_v36 = vadd.f32 %v586_v31, %v584_v33  ;;  %v595_v41 = vmul.f32 %v1918_v15, %v1918_v15  ;;  %v592_v43 = vmul.f32 %v1938_v26, %v1938_v26  ;;  %v597_v45 = vmul.f32 %v1920_v16, %v1920_v16 }
 0x197   : > { %v601_v35 = vadd.f32 %v600_v29, %v589_v20  ;;  %v594_v47 = vmul.f32 %v1940_v27, %v1940_v27  ;;  %v596_v50 = vmul.f32 %v1942_v28, %v1942_v28  ;;  %v598_v53 = vmul.f32 %v1944_v30, %v1944_v30 }
 0x198   : > { %v613_v40 = vadd.f32 %v612_v36, %v588_v32  ;;  %v1655_v7 = vmov 1966171168   ;;  %v637_v17 = vlaneseq }
 0x199   : > { %v602_v38 = vadd.f32 %v601_v35, %v591_v34  ;;  %v635_v8 = vunpack.c.l.s4 %v1655_v7  ;;  %v537_v34 = vld [vmem:[%s2119_s2] sm:$0x3] }
 0x19a   : > { %v614_v44 = vadd.f32 %v613_v40, %v590_v39  ;;  %v638_v19 = vshrl.u32 %v637_v17, 7 }
 0x19b   : > { %v603_v42 = vadd.f32 %v602_v38, %v593_v37  ;;  %v636_v18 = vunpack.c.0.s8 %v635_v8 }
 0x19c   : > { %v615_v48 = vadd.f32 %v614_v44, %v592_v43  ;;  %v653_v32 = vsub.s32 0, %v638_v19  ;;  %v657_v36 = vsub.s32 1, %v638_v19  ;;  %v538_v44 = vld [vmem:[%s2120_s3] sm:$0x3] }
 0x19d   : > { %v604_v46 = vadd.f32 %v603_v42, %v595_v41  ;;  %v639_v21 = vsub.s32 %v636_v18, %v638_v19 }
 0x19e   : > { %v616_v51 = vadd.f32 %v615_v48, %v594_v47 }
 0x19f   : > { %v605_v49 = vadd.f32 %v604_v46, %v597_v45 }
 0x1a0   : > { %v617_v54 = vadd.f32 %v616_v51, %v596_v50  ;;  %v681_v51 = vrot.slane %v538_v44, %v653_v32 }
 0x1a1   : > { %v606_v52 = vrot.slane %v605_v49, 4 }
 0x1a2   : > { %v618_v56 = vadd.f32 %v617_v54, %v598_v53 }
 0x1a3   : > { %v607_v55 = vadd.f32 %v606_v52, %v605_v49 }
 0x1a4   : > { %v619_v58 = vrot.slane %v618_v56, 4 }
 0x1a5   : > { %v608_v57 = vrot.slane %v607_v55, 2 }
 0x1a6   : > { %v620_v60 = vadd.f32 %v619_v58, %v618_v56 }
 0x1a7   : > { %v609_v59 = vadd.f32 %v608_v57, %v607_v55 }
 0x1a8   : > { %v621_v62 = vrot.slane %v620_v60, 2 }
 0x1a9   : > { %v610_v61 = vrot.slane %v609_v59, 1 }
 0x1aa   : > { %v622_v0 = vadd.f32 %v621_v62, %v620_v60 }
 0x1ab   : > { %v611_v63 = vadd.f32 %v610_v61, %v609_v59 }
 0x1ac   : > { %v623_v2 = vrot.slane %v622_v0, 1 }
 0x1ad   : > { %v625_v1 = vmul.f32 0.015625, %v611_v63 }
 0x1ae   : > { %v624_v4 = vadd.f32 %v623_v2, %v622_v0 }
 0x1af   : > { %v627_v3 = vadd.f32 1e-05, %v625_v1 }
 0x1b0   : > { %v626_v5 = vmul.f32 0.015625, %v624_v4 }
 0x1b1   : > { %1431 = vrsqrt.f32 %v627_v3 }
 0x1b2   : > { %v628_v6 = vadd.f32 1e-05, %v626_v5 }
 0x1b4   : > { %1433 = vrsqrt.f32 %v628_v6 }
 0x1bb   : > { %v1432_v20 = vpop.eup %1431 }
 0x1be   : > { %v1434_v29 = vpop.eup %1433 }
 0x1bf   : > { %v633_v33 = vcombine.low %v1432_v20, %v1434_v29 }
 0x1c1   : > { %v640_v31 = vrot.slane %v633_v33, %v639_v21 }
 0x1c3   : > { %v647_v35 = vrot.slane %v640_v31, %v639_v21 }
 0x1c5   : > { %v649_v37 = vmul.f32 %v647_v35, %v537_v34 }
 0x1c7   : > { %v654_v38 = vrot.slane %v649_v37, %v653_v32  ;;  %v658_v39 = vrot.slane %v649_v37, %v657_v36 }
 0x1c9   : > { %v661_v40 = vmul.f32 %v654_v38, %v1906_v9  ;;  %v662_v41 = vmul.f32 %v658_v39, %v1930_v22  ;;  %v663_v42 = vmul.f32 %v654_v38, %v1908_v10  ;;  %v664_v43 = vmul.f32 %v658_v39, %v1932_v23 }
 0x1ca   : > { %v665_v45 = vmul.f32 %v654_v38, %v1910_v11  ;;  %v666_v46 = vmul.f32 %v658_v39, %v1934_v24  ;;  %v667_v47 = vmul.f32 %v654_v38, %v1912_v12  ;;  %v668_v48 = vmul.f32 %v658_v39, %v1936_v25 }
 0x1cb   : > { %v669_v9 = vmul.f32 %v654_v38, %v1914_v13  ;;  %v670_v22 = vmul.f32 %v658_v39, %v1938_v26  ;;  %v671_v10 = vmul.f32 %v654_v38, %v1916_v14  ;;  %v672_v23 = vmul.f32 %v658_v39, %v1940_v27 }
 0x1cc   : > { %v673_v49 = vmul.f32 %v654_v38, %v1918_v15  ;;  %v674_v50 = vmul.f32 %v658_v39, %v1942_v28  ;;  %v675_v11 = vmul.f32 %v654_v38, %v1920_v16  ;;  %v676_v24 = vmul.f32 %v658_v39, %v1944_v30 }
 0x1cd   : > { %v685_v12 = vrot.slane %v538_v44, %v657_v36  ;;  %v688_v52 = vadd.f32 %v681_v51, %v661_v40  ;;  %v690_v53 = vadd.f32 %v681_v51, %v663_v42  ;;  %v692_v54 = vadd.f32 %v681_v51, %v665_v45 }
 0x1ce   : > { %v1992_v55 = vadd.f32 %v681_v51, %v667_v47  ;;  %v1996_v57 = vadd.f32 %v681_v51, %v669_v9  ;;  %v2000_v59 = vadd.f32 %v681_v51, %v671_v10  ;;  %v2006_v63 = vadd.f32 %v681_v51, %v673_v49 }
 0x1cf   : > { %v689_v25 = vadd.f32 %v685_v12, %v662_v41  ;;  %v691_v13 = vadd.f32 %v685_v12, %v664_v43  ;;  %v693_v26 = vadd.f32 %v685_v12, %v666_v46  ;;  %v720_v14 = vmul.f32 0.70710677, %v688_v52 }
 0x1d0   : > { %v722_v56 = vmul.f32 0.70710677, %v690_v53  ;;  %v1994_v15 = vadd.f32 %v685_v12, %v668_v48  ;;  %v724_v16 = vmul.f32 0.70710677, %v692_v54  ;;  %v1998_v30 = vadd.f32 %v685_v12, %v670_v22 }
 0x1d1   : > { %v721_v27 = vmul.f32 0.70710677, %v689_v25  ;;  %v723_v28 = vmul.f32 0.70710677, %v691_v13  ;;  %1435 = verf.f32 %v720_v14  ;;  %v725_v58 = vmul.f32 0.70710677, %v693_v26 }
 0x1d2   : > { %v726_v60 = vmul.f32 0.70710677, %v1992_v55  ;;  %v2003_v61 = vadd.f32 %v685_v12, %v672_v23  ;;  %v727_v62 = vmul.f32 0.70710677, %v1994_v15  ;;  %v728_v0 = vmul.f32 0.70710677, %v1996_v57 }
 0x1d3   : > { %1437 = verf.f32 %v721_v27  ;;  %v2009_v1 = vadd.f32 %v685_v12, %v674_v50  ;;  %v729_v2 = vmul.f32 0.70710677, %v1998_v30  ;;  %v2012_v3 = vadd.f32 %v681_v51, %v675_v11 }
 0x1d4   : > { %1439 = verf.f32 %v722_v56  ;;  %v730_v4 = vmul.f32 0.70710677, %v2000_v59  ;;  %v2015_v5 = vadd.f32 %v685_v12, %v676_v24  ;;  %v731_v6 = vmul.f32 0.70710677, %v2003_v61 }
 0x1d5   : > { %1441 = verf.f32 %v723_v28  ;;  %v732_v7 = vmul.f32 0.70710677, %v2006_v63  ;;  %v733_v8 = vmul.f32 0.70710677, %v2009_v1  ;;  %v734_v18 = vmul.f32 0.70710677, %v2012_v3 }
 0x1d6   : > { %1443 = verf.f32 %v724_v16  ;;  %v704_v20 = vmul.f32 0.5, %v688_v52  ;;  %v735_v21 = vmul.f32 0.70710677, %v2015_v5  ;;  %v705_v31 = vmul.f32 0.5, %v689_v25 }
 0x1d7   : > { %1445 = verf.f32 %v725_v58  ;;  %v706_v32 = vmul.f32 0.5, %v690_v53  ;;  %v707_v39 = vmul.f32 0.5, %v691_v13  ;;  %v708_v43 = vmul.f32 0.5, %v692_v54 }
 0x1d8   : > { %1447 = verf.f32 %v726_v60  ;;  %v709_v47 = vmul.f32 0.5, %v693_v26  ;;  %v710_v10 = vmul.f32 0.5, %v1992_v55  ;;  %v711_v24 = vmul.f32 0.5, %v1994_v15 }
 0x1d9   : > { %1449 = verf.f32 %v727_v62  ;;  %v712_v53 = vmul.f32 0.5, %v1996_v57  ;;  %v713_v14 = vmul.f32 0.5, %v1998_v30  ;;  %v714_v28 = vmul.f32 0.5, %v2000_v59 }
 0x1da   : > { %1451 = verf.f32 %v728_v0  ;;  %v715_v62 = vmul.f32 0.5, %v2003_v61 }
 0x1db   : > { %1453 = verf.f32 %v729_v2  ;;  %v1436_v17 = vpop.eup %1435 }
 0x1dc   : > { %1455 = verf.f32 %v730_v4  ;;  %v752_v29 = vadd.f32 1.0, %v1436_v17  ;;  %v717_v17 = vmul.f32 0.5, %v2009_v1 }
 0x1dd   : > { %v1438_v19 = vpop.eup %1437  ;;  %1457 = verf.f32 %v731_v6  ;;  %v716_v6 = vmul.f32 0.5, %v2006_v63 }
 0x1de   : > { %v1440_v33 = vpop.eup %1439  ;;  %1459 = verf.f32 %v732_v7  ;;  %v753_v34 = vadd.f32 1.0, %v1438_v19  ;;  %v768_v37 = vmul.f32 %v752_v29, %v704_v20  ;;  %v718_v20 = vmul.f32 0.5, %v2012_v3 }
 0x1df   : > { %v1442_v35 = vpop.eup %1441  ;;  %1461 = verf.f32 %v733_v8  ;;  %v754_v36 = vadd.f32 1.0, %v1440_v33  ;;  %v719_v33 = vmul.f32 0.5, %v2015_v5 }
 0x1e0   : > { %v1444_v38 = vpop.eup %1443  ;;  %1463 = verf.f32 %v734_v18  ;;  %v755_v40 = vadd.f32 1.0, %v1442_v35  ;;  %v769_v41 = vmul.f32 %v753_v34, %v705_v31 }
 0x1e1   : > { %v1446_v42 = vpop.eup %1445  ;;  %1465 = verf.f32 %v735_v21  ;;  %v756_v44 = vadd.f32 1.0, %v1444_v38  ;;  %v770_v45 = vmul.f32 %v754_v36, %v706_v32 }
 0x1e2   : > { %v1448_v46 = vpop.eup %1447  ;;  %v757_v48 = vadd.f32 1.0, %v1446_v42  ;;  %v771_v9 = vmul.f32 %v755_v40, %v707_v39 }
 0x1e3   : > { %v1450_v22 = vpop.eup %1449  ;;  %v758_v23 = vadd.f32 1.0, %v1448_v46  ;;  %v772_v49 = vmul.f32 %v756_v44, %v708_v43  ;;  %v784_v50 = vpack.c.bf16 %v770_v45, %v768_v37 }
 0x1e4   : > { %v1452_v11 = vpop.eup %1451  ;;  %v759_v51 = vadd.f32 1.0, %v1450_v22  ;;  %v773_v12 = vmul.f32 %v757_v48, %v709_v47  ;;  %v785_v52 = vpack.c.bf16 %v771_v9, %v769_v41 }
 0x1e5   : > { %v1454_v25 = vpop.eup %1453  ;;  %v760_v13 = vadd.f32 1.0, %v1452_v11  ;;  %v774_v54 = vmul.f32 %v758_v23, %v710_v10  ;;  %792 = vst [vmem:[#allocation2] sm:$0xff] %v784_v50 }
 0x1e6   : > { %v1456_v26 = vpop.eup %1455  ;;  %v761_v27 = vadd.f32 1.0, %v1454_v25  ;;  %v775_v55 = vmul.f32 %v759_v51, %v711_v24  ;;  %793 = vst [vmem:[#allocation2 + $0x8] sm:$0xff] %v785_v52 }
 0x1e7   : > { %v1458_v56 = vpop.eup %1457  ;;  %v762_v16 = vadd.f32 1.0, %v1456_v26  ;;  %v776_v15 = vmul.f32 %v760_v13, %v712_v53  ;;  %v786_v58 = vpack.c.bf16 %v774_v54, %v772_v49 }
 0x1e8   : > { %v1460_v60 = vpop.eup %1459  ;;  %v763_v0 = vadd.f32 1.0, %v1458_v56  ;;  %v777_v57 = vmul.f32 %v761_v27, %v713_v14  ;;  %v787_v2 = vpack.c.bf16 %v775_v55, %v773_v12 }
 0x1e9   : > { %v1462_v4 = vpop.eup %1461  ;;  %v764_v7 = vadd.f32 1.0, %v1460_v60  ;;  %v778_v30 = vmul.f32 %v762_v16, %v714_v28  ;;  %794 = vst [vmem:[#allocation2 + $0x10] sm:$0xff] %v786_v58 }
 0x1ea   : > { %v1464_v8 = vpop.eup %1463  ;;  %v765_v18 = vadd.f32 1.0, %v1462_v4  ;;  %v779_v59 = vmul.f32 %v763_v0, %v715_v62  ;;  %795 = vst [vmem:[#allocation2 + $0x18] sm:$0xff] %v787_v2 }
 0x1eb   : > { %v1466_v19 = vpop.eup %1465  ;;  %v766_v21 = vadd.f32 1.0, %v1464_v8  ;;  %v780_v61 = vmul.f32 %v764_v7, %v716_v6  ;;  %v788_v29 = vpack.c.bf16 %v778_v30, %v776_v15 }
 0x1ec   : > { %v767_v31 = vadd.f32 1.0, %v1466_v19  ;;  %v781_v34 = vmul.f32 %v765_v18, %v717_v17  ;;  %v789_v63 = vpack.c.bf16 %v779_v59, %v777_v57 }
 0x1ed   : > { %v782_v35 = vmul.f32 %v766_v21, %v718_v20  ;;  %796 = vst [vmem:[#allocation2 + $0x20] sm:$0xff] %v788_v29 }
 0x1ee   : > { %v783_v32 = vmul.f32 %v767_v31, %v719_v33  ;;  %797 = vst [vmem:[#allocation2 + $0x28] sm:$0xff] %v789_v63 }
 0x1ef   : > { %v790_v36 = vpack.c.bf16 %v782_v35, %v780_v61 }
 0x1f0   : > { %v791_v1 = vpack.c.bf16 %v783_v32, %v781_v34 }
 0x1f1   : > { %798 = vst [vmem:[#allocation2 + $0x30] sm:$0xff] %v790_v36 }
 0x1f2   : > { %799 = vst [vmem:[#allocation2 + $0x38] sm:$0xff] %v791_v1 }
 0x1f3 PF: > { %v1467_v3 = vld [vmem:[%s1883_s30 + $0x40] sm:$0xff]   ;;  %v1469_v37 = vld [vmem:[%s1883_s30 + $0x48] sm:$0xff]   ;;  %v1471_v39 = vld [vmem:[%s1883_s30 + $0x50] sm:$0xff]   ;;  %s1256_s10 = sshll.u32 %s1721_s28, 7  ;;  %s1099_s16 = sshll.u32 %s1902_s20, 4  ;;  %s2065_s16 = int_to_ptr.vmem [resolvable:$true] %s1099_s16 }
 0x1f4   : > { %v1468_v5 = vld [vmem:[%s1883_s30] sm:$0xff]   ;;  %1259 = vmatprep.subr.bf16.mxu0 %v1467_v3  ;;  %1315 = vmatprep.subr.bf16.mxu1 %v1467_v3  ;;  %v1470_v38 = vld [vmem:[%s1883_s30 + $0x8] sm:$0xff]   ;;  %v1472_v40 = vld [vmem:[%s1883_s30 + $0x10] sm:$0xff]   ;;  %s2063_s19 = scalar_lea.hbm %s2124_s7, %s1256_s10  ;;  %s1087_s18 = scalar_lea.sflag [#allocation5], %s1880_s21 }
 0x1f5   : > { %1260 = vmatpush3.bf16.msra.mxu0 %v1468_v5  ;;  %1323 = vmatpush3.bf16.msra.mxu1 %v1468_v5  ;;  %v1473_v41 = vld [vmem:[%s1883_s30 + $0x58] sm:$0xff]   ;;  %v1475_v43 = vld [vmem:[%s1883_s30 + $0x60] sm:$0xff]   ;;  %v1477_v45 = vld [vmem:[%s1883_s30 + $0x68] sm:$0xff]   ;;  %p2151_p1 = scmp.ne.s32.totalorder %s2136_s13, 0  ;;  %s1656_s12 = smov [#allocation9]  }
 0x1f6   : > { %1261 = vmatprep.subr.bf16.mxu0 %v1469_v37  ;;  %1316 = vmatprep.subr.bf16.mxu1 %v1469_v37  ;;  %v1474_v42 = vld [vmem:[%s1883_s30 + $0x18] sm:$0xff]   ;;  %v1476_v44 = vld [vmem:[%s1883_s30 + $0x20] sm:$0xff]   ;;  %v801_v46 = vld [vmem:[#allocation2 + $0x8] sm:$0xff]  ;;  %s1575_s9 = sshll.u32 %s1656_s12, 4  ;;  %s1576_s9 = int_to_ptr.vmem [resolvable:$false] %s1575_s9 }
 0x1f7   : > { %v805_v47 = vld [vmem:[#allocation2 + $0x28] sm:$0xff]  ;;  %968 = vmatprep.mubr.bf16.mxu0 %v801_v46  ;;  %v1479_v9 = vld [vmem:[%s1883_s30 + $0x70] sm:$0xff]   ;;  %v1481_v10 = vld [vmem:[%s1883_s30 + $0x78] sm:$0xff]   ;;  %s1577_s8 = scalar_lea.vmem %s1576_s9, 2048  ;;  %p1578_p11 = scmp.lt.s32.totalorder %s2065_s16, %s1576_s9 }
 0x1f8   : > { %984 = vmatprep.mubr.bf16.mxu1 %v805_v47  ;;  %v1478_v48 = vld [vmem:[%s1883_s30 + $0x28] sm:$0xff]   ;;  %v1480_v22 = vld [vmem:[%s1883_s30 + $0x30] sm:$0xff]   ;;  %v1482_v23 = vld [vmem:[%s1883_s30 + $0x38] sm:$0xff]  }
 0x1f9   : > { %1262 = vmatpush3.bf16.msra.mxu0 %v1470_v38  ;;  %1324 = vmatpush3.bf16.msra.mxu1 %v1470_v38  ;;  %v800_v49 = vld [vmem:[#allocation2] sm:$0xff]  ;;  %v803_v11 = vld [vmem:[#allocation2 + $0x18] sm:$0xff]  ;;  %v802_v51 = vld [vmem:[#allocation2 + $0x10] sm:$0xff] }
 0x1fa   : > { %1263 = vmatprep.subr.bf16.mxu0 %v1471_v39  ;;  %1317 = vmatprep.subr.bf16.mxu1 %v1471_v39  ;;  %v804_v50 = vld [vmem:[#allocation2 + $0x20] sm:$0xff]  ;;  %v807_v24 = vld [vmem:[#allocation2 + $0x38] sm:$0xff]  ;;  %v806_v12 = vld [vmem:[#allocation2 + $0x30] sm:$0xff] }
 0x1fd   : > { %1264 = vmatpush3.bf16.msra.mxu0 %v1472_v40  ;;  %1325 = vmatpush3.bf16.msra.mxu1 %v1472_v40 }
 0x1fe   : > { %1265 = vmatprep.subr.bf16.mxu0 %v1473_v41  ;;  %1318 = vmatprep.subr.bf16.mxu1 %v1473_v41 }
 0x201   : > { %1266 = vmatpush3.bf16.msra.mxu0 %v1474_v42  ;;  %1326 = vmatpush3.bf16.msra.mxu1 %v1474_v42 }
 0x202   : > { %1267 = vmatprep.subr.bf16.mxu0 %v1475_v43  ;;  %1319 = vmatprep.subr.bf16.mxu1 %v1475_v43 }
 0x205   : > { %1268 = vmatpush3.bf16.msra.mxu0 %v1476_v44  ;;  %1327 = vmatpush3.bf16.msra.mxu1 %v1476_v44 }
 0x206   : > { %1269 = vmatprep.subr.bf16.mxu0 %v1477_v45  ;;  %1320 = vmatprep.subr.bf16.mxu1 %v1477_v45 }
 0x209   : > { %1270 = vmatpush3.bf16.msra.mxu0 %v1478_v48  ;;  %1328 = vmatpush3.bf16.msra.mxu1 %v1478_v48 }
 0x20a   : > { %1271 = vmatprep.subr.bf16.mxu0 %v1479_v9  ;;  %1321 = vmatprep.subr.bf16.mxu1 %v1479_v9 }
 0x20d   : > { %1272 = vmatpush3.bf16.msra.mxu0 %v1480_v22  ;;  %1329 = vmatpush3.bf16.msra.mxu1 %v1480_v22 }
 0x20e   : > { %1273 = vmatprep.subr.bf16.mxu0 %v1481_v10  ;;  %1322 = vmatprep.subr.bf16.mxu1 %v1481_v10 }
 0x211   : > { %1274 = vmatpush3.bf16.msra.mxu0 %v1482_v23  ;;  %1330 = vmatpush3.bf16.msra.mxu1 %v1482_v23 }
 0x214   : > { %969 = vmatmul.mubr.bf16.vlgmr.msra.gmra.mrb[0].mxu0 %v800_v49  ;;  %985 = vmatmul.mubr.bf16.vlgmr.msra.gmra.mrb[0].mxu1 %v804_v50 }
 0x215   : > { %976 = vmatprep.mubr.bf16.mxu0 %v803_v11  ;;  %992 = vmatprep.mubr.bf16.mxu1 %v807_v24 }
 0x21c   : > { %977 = vmatmul.mubr.bf16.gmra.mrb[4].mxu0 %v802_v51  ;;  %993 = vmatmul.mubr.bf16.gmra.mrb[4].mxu1 %v806_v12 }
 0x2e7   : > { %v1275_v52 = vpop.f32.mrb[0].mxu0  ;;  %v1287_v25 = vpop.f32.mrb[0].mxu1 }
 0x2e8   : > { %v1276_v53 = vpop.f32.mrb[1].mxu0  ;;  %v1288_v13 = vpop.f32.mrb[1].mxu1 }
 0x2e9   : > { %v1277_v54 = vadd.f32 %v1276_v53, %v1275_v52  ;;  %v1278_v26 = vpop.f32.mrb[2].mxu0  ;;  %v1289_v14 = vadd.f32 %v1288_v13, %v1287_v25  ;;  %v1290_v27 = vpop.f32.mrb[2].mxu1 }
 0x2ea   : > { %v1279_v55 = vpop.f32.mrb[3].mxu0  ;;  %v1291_v56 = vpop.f32.mrb[3].mxu1 }
 0x2eb   : > { %v1280_v28 = vadd.f32 %v1279_v55, %v1278_v26  ;;  %v1292_v16 = vadd.f32 %v1291_v56, %v1290_v27  ;;  %v1051_v26 = vlaneseq  ;;  %v1001_v27 = vld [vmem:[%s347_s29] sm:$0x1] }
 0x2ed   : > { %v1003_v15 = vadd.f32 %v1280_v28, %v1277_v54 }
 0x2ef   : > { %v1281_v58 = vpop.f32.mrb[4].mxu0  ;;  %v1293_v60 = vpop.f32.mrb[4].mxu1 }
 0x2f0   : > { %v1282_v62 = vpop.f32.mrb[5].mxu0  ;;  %v1294_v0 = vpop.f32.mrb[5].mxu1 }
 0x2f1   : > { %v1283_v57 = vadd.f32 %v1282_v62, %v1281_v58  ;;  %v1284_v2 = vpop.f32.mrb[6].mxu0  ;;  %v1295_v4 = vadd.f32 %v1294_v0, %v1293_v60  ;;  %v1296_v6 = vpop.f32.mrb[6].mxu1 }
 0x2f2   : > { %v1285_v7 = vpop.f32.mrb[7].mxu0  ;;  %v1297_v30 = vpop.f32.mrb[7].mxu1 }
 0x2f3   : > { %v1004_v8 = vadd.f32 %v1283_v57, %v1003_v15  ;;  %v1286_v17 = vadd.f32 %v1285_v7, %v1284_v2  ;;  %v1298_v18 = vadd.f32 %v1297_v30, %v1296_v6  ;;  %v1254_v15 = vld [vmem:[%s350_s22] ss:$0 sm:$0xff]  ;;  %s1571_s22 = scalar_lea.vmem %s2065_s16, 1024 }
 0x2f4   : > { %p1572_p4 = scmp.ne.s32.totalorder %s2065_s16, %s1571_s22  ;;  %p1579_p12 = scmp.lt.s32.totalorder %s1577_s8, %s1571_s22 }
 0x2f5   : > { %v1005_v59 = vadd.f32 %v1286_v17, %v1004_v8 }
 0x2f6   : > { %p1573_p0 = pnand %p1572_p4, %p2151_p1  ;;  %p1580_p3 = por %p1579_p12, %p1578_p11 }
 0x2f7   : > { %v1006_v19 = vadd.f32 %v1289_v14, %v1005_v59 }
 0x2f8   : > { %p1574_p5 = pneg %p1573_p0 }
 0x2f9   : > { %v1007_v20 = vadd.f32 %v1292_v16, %v1006_v19 }
 0x2fa   : > { %p1581_p6 = pnand %p1580_p3, %p1574_p5 }
 0x2fb   : > { %v1008_v21 = vadd.f32 %v1295_v4, %v1007_v20 }
 0x2fd   : > { %v1009_v61 = vadd.f32 %v1298_v18, %v1008_v21 }
 0x2ff   : > { %v1010_v29 = vrot.slane %v1009_v61, 4 }
 0x301   : > { %v1011_v33 = vadd.f32 %v1010_v29, %v1009_v61 }
 0x303   : > { %v1012_v31 = vrot.slane %v1011_v33, 2 }
 0x305   : > { %v1013_v34 = vadd.f32 %v1012_v31, %v1011_v33 }
 0x307   : > { %v1014_v63 = vrot.slane %v1013_v34, 1 }
 0x309   : > { %v1015_v35 = vadd.f32 %v1014_v63, %v1013_v34 }
 0x30b   : > { %v1016_v32 = vmul.f32 0.015625, %v1015_v35 }
 0x30d   : > { %v1017_v36 = vsub.f32 %v1277_v54, %v1016_v32  ;;  %v1018_v1 = vsub.f32 %v1280_v28, %v1016_v32  ;;  %v1019_v3 = vsub.f32 %v1283_v57, %v1016_v32  ;;  %v1020_v5 = vsub.f32 %v1286_v17, %v1016_v32 }
 0x30e   : > { %v1021_v37 = vsub.f32 %v1289_v14, %v1016_v32  ;;  %v1022_v38 = vsub.f32 %v1292_v16, %v1016_v32  ;;  %v1023_v39 = vsub.f32 %v1295_v4, %v1016_v32  ;;  %v1024_v40 = vsub.f32 %v1298_v18, %v1016_v32 }
 0x30f   : > { %v1025_v41 = vmul.f32 %v1017_v36, %v1017_v36  ;;  %v1026_v42 = vmul.f32 %v1018_v1, %v1018_v1  ;;  %v1027_v43 = vmul.f32 %v1019_v3, %v1019_v3  ;;  %v1028_v45 = vmul.f32 %v1020_v5, %v1020_v5 }
 0x310   : > { %v1029_v47 = vmul.f32 %v1021_v37, %v1021_v37  ;;  %v1030_v9 = vmul.f32 %v1022_v38, %v1022_v38  ;;  %v1031_v10 = vmul.f32 %v1023_v39, %v1023_v39  ;;  %v1032_v49 = vmul.f32 %v1024_v40, %v1024_v40 }
 0x311   : > { %v1033_v44 = vadd.f32 %v1026_v42, %v1025_v41  ;;  %v1052_v14 = vshrl.u32 %v1051_v26, 7 }
 0x313   : > { %v1034_v46 = vadd.f32 %v1033_v44, %v1027_v43  ;;  %v1053_v55 = vsub.s32 0, %v1052_v14 }
 0x315   : > { %v1035_v48 = vadd.f32 %v1034_v46, %v1028_v45 }
 0x317   : > { %v1036_v22 = vadd.f32 %v1035_v48, %v1029_v47 }
 0x319   : > { %v1037_v23 = vadd.f32 %v1036_v22, %v1030_v9 }
 0x31b   : > { %v1038_v50 = vadd.f32 %v1037_v23, %v1031_v10 }
 0x31d   : > { %v1039_v11 = vadd.f32 %v1038_v50, %v1032_v49 }
 0x31f   : > { %v1040_v24 = vrot.slane %v1039_v11, 4 }
 0x321   : > { %v1041_v51 = vadd.f32 %v1040_v24, %v1039_v11 }
 0x323   : > { %v1042_v12 = vrot.slane %v1041_v51, 2 }
 0x325   : > { %v1043_v52 = vadd.f32 %v1042_v12, %v1041_v51 }
 0x327   : > { %v1044_v25 = vrot.slane %v1043_v52, 1 }
 0x329   : > { %v1045_v53 = vadd.f32 %v1044_v25, %v1043_v52 }
 0x32b   : > { %v1046_v13 = vmul.f32 0.015625, %v1045_v53 }
 0x32d   : > { %v1047_v54 = vadd.f32 1e-05, %v1046_v13 }
 0x32f   : > { %1483 = vrsqrt.f32 %v1047_v54 }
 0x339   : > { %v1484_v56 = vpop.eup %1483 }
 0x33a   : > { %v1049_v28 = vmul.f32 %v1484_v56, %v1001_v27 }
 0x33c   : > { %v1054_v16 = vrot.slane %v1049_v28, %v1053_v55 }
 0x33e   : > { %v1056_v58 = vmul.f32 %v1054_v16, %v1017_v36  ;;  %v1057_v60 = vmul.f32 %v1054_v16, %v1018_v1  ;;  %v1058_v62 = vmul.f32 %v1054_v16, %v1019_v3  ;;  %v1059_v0 = vmul.f32 %v1054_v16, %v1020_v5 }
 0x33f   : > { %v1060_v57 = vmul.f32 %v1054_v16, %v1021_v37  ;;  %v1061_v2 = vmul.f32 %v1054_v16, %v1022_v38  ;;  %v1062_v4 = vmul.f32 %v1054_v16, %v1023_v39  ;;  %v1063_v6 = vmul.f32 %v1054_v16, %v1024_v40 }
 0x340   : > { %v1070_v7 = vadd.f32 %v1254_v15, %v1056_v58  ;;  %v1071_v30 = vadd.f32 %v1254_v15, %v1057_v60  ;;  %v1072_v8 = vadd.f32 %v1254_v15, %v1058_v62  ;;  %v1073_v17 = vadd.f32 %v1254_v15, %v1059_v0 }
 0x341   : > { %v1074_v18 = vadd.f32 %v1254_v15, %v1060_v57  ;;  %v1075_v59 = vadd.f32 %v1254_v15, %v1061_v2  ;;  %v1076_v19 = vadd.f32 %v1254_v15, %v1062_v4  ;;  %v1077_v20 = vadd.f32 %v1254_v15, %v1063_v6 }
 0x342   : > { %1078 = vst [vmem:[%s1902_s20] sm:$0xff] %v1070_v7  ;;  %1079 = vst [vmem:[%s1902_s20 + $0x8] sm:$0xff] %v1071_v30 }
 0x343   : > { %1080 = vst [vmem:[%s1902_s20 + $0x10] sm:$0xff] %v1072_v8  ;;  %1081 = vst [vmem:[%s1902_s20 + $0x18] sm:$0xff] %v1073_v17 }
 0x344   : > { %1082 = vst [vmem:[%s1902_s20 + $0x20] sm:$0xff] %v1074_v18  ;;  %1083 = vst [vmem:[%s1902_s20 + $0x28] sm:$0xff] %v1075_v59 }
 0x345   : > { %1084 = vst [vmem:[%s1902_s20 + $0x30] sm:$0xff] %v1076_v19  ;;  %1085 = vst [vmem:[%s1902_s20 + $0x38] sm:$0xff] %v1077_v20 }
 0x346   : > { %1584 = shalt.err (!%p1581_p6)
}
 0x347   : > { %s1585_s20 = scalar_lea.hbm %s2063_s19, 1024  ;;  %s1589_s30 = scalar_lea.hbm %s2124_s7, 2048 }
 0x348   : > { %p1586_p13 = scmp.ne.s32.totalorder %s2063_s19, %s1585_s20  ;;  %p1590_p9 = scmp.lt.u32.totalorder %s2063_s19, %s2124_s7 }
 0x349   : > { %p1591_p10 = scmp.lt.u32.totalorder %s1589_s30, %s1585_s20  ;;  %p1593_p4 = scmp.lt.u32.totalorder %s1585_s20, %s2063_s19 }
 0x34a   : > { %p1587_p7 = pnand %p1586_p13, %p2151_p1 }
 0x34b   : > { %p1592_p2 = por %p1591_p10, %p1590_p9 }
 0x34c   : > { %p1588_p8 = pneg %p1587_p7 }
 0x34d   : > { %p1594_p0 = por %p1593_p4, %p1592_p2 }
 0x34f   : > { %p1595_p5 = pnand %p1594_p0, %p1588_p8 }
 0x351   : > { %1598 = shalt.err (!%p1595_p5)
}
 0x352   : > { %s1657_s11 = smov 128   ;;  %s1658_s28 = smov 256  }
 0x353   : > { %s1659_s29 = smov 8  }
 0x354   : > { %1341 = dma.vmem_to_hbm [thread:$0]  (%p2151_p1), %s2065_s16, 1024, %s2063_s19, %s1087_s18, %s1657_s11, %s1658_s28, %s1659_s29  }
 0x355 PF: > { %s1114_s22 = sand.u32 1, %s1633_s24   ;;  %p2152_p11 = scmp.ne.s32.totalorder %s2137_s14, 0 }
 0x356   : > { %p2153_p12 = scmp.ge.s32.totalorder %s1645_s27, 2  ;;  %s1115_s12 = scalar_lea.sflag [#allocation5], %s1114_s22 }
 0x358   : > { %p1355_p3 = pnand %p2153_p12, %p2152_p11 }
 0x35a   : > { %1628 = dma.done.wait (!%p1355_p3), %s1115_s12, 1024  }
 0x35b   : > { %1630 = vsyncadd (!%p1355_p3), %s1115_s12, 4294966272  ;;  %s2154_s27 = sld [smem:[#allocation14_spill]]  ;;  %s2155_s9 = sld [smem:[#allocation15_spill]] }
 0x35c   : > { %s2156_s24 = smov %s1637_s25  ;;  %s2157_s25 = smov %s1641_s26 }
 0x361   : > { %p19_p6 = scmp.ge.s32.totalorder %s2154_s27, 4   ;;  %s2158_s26 = smov %s2155_s9 }
 0x363   :  { %21 = sbr.rel (!%p19_p6) target bundleno = 5 (0x5), region = 110 }
 0x36a   :  { %1120 = vsyncpa [#allocation4], 1 }
 0x36b   :  { %1122 = vsyncpa [#allocation4 + $0x1], 1 }
 0x36c   :  { %1123 = vsyncpa [#allocation7], 1 }
 0x36d   :  { %1124 = vsyncpa [#allocation5], 1 }
 0x36e   :  { %1126 = vsyncpa [#allocation5 + $0x1], 1 }

</bundles_post_ra>
